<compile_context>
chip_gen: v5e
topology: v5e:2x2
jax: 0.10.0
libtpu: 0.0.40
codegen_flags: <defaults>
</compile_context>

<pallas_src>
import jax
import jax.numpy as jnp
from jax.experimental import pallas as pl
from jax.experimental.pallas import tpu as pltpu

LANE = 128


def _round_up(n, m):
    return ((n + m - 1) // m) * m


def deep_fnn_kernel(x_ref, w1_ref, b1_ref, w2_ref, b2_ref, w3_ref, b3_ref, o_ref):
    # fc1 + ReLU  (bf16 MXU operands, f32 accumulation / elementwise)
    x = x_ref[...].astype(jnp.bfloat16)
    h1 = jnp.dot(x, w1_ref[...], preferred_element_type=jnp.float32)
    h1 = jnp.maximum(h1 + b1_ref[...], 0.0)
    # fc2 + ReLU
    h2 = jnp.dot(h1.astype(jnp.bfloat16), w2_ref[...], preferred_element_type=jnp.float32)
    h2 = jnp.maximum(h2 + b2_ref[...], 0.0)
    # fc3 (no activation)
    h3 = jnp.dot(h2.astype(jnp.bfloat16), w3_ref[...], preferred_element_type=jnp.float32)
    o_ref[...] = (h3 + b3_ref[...]).astype(o_ref.dtype)


def deep_fnn(x, w1, b1, w2, b2, w3, b3, *, tile_b=256):
    """x: [B, in]; w_i stored [in_features, out_features]; b_i: [1, out_features]."""
    B, in_dim = x.shape
    h1_dim = w1.shape[1]
    h2_dim = w2.shape[1]
    out_dim = w3.shape[1]

    in_pad = _round_up(in_dim, LANE)
    h1_pad = _round_up(h1_dim, LANE)   # 200 -> 256
    h2_pad = _round_up(h2_dim, LANE)   # 64  -> 128
    out_pad = _round_up(out_dim, LANE)  # 4   -> 128

    # Batch tiling: large tiles when the batch is large, otherwise one tile
    # rounded up to the sublane multiple.
    tile_b = min(tile_b, _round_up(B, 8))
    b_pad = _round_up(B, tile_b)
    grid = (b_pad // tile_b,)

    # Zero-pad to lane multiples (exact: padded inputs are zero, padded weight
    # rows are zero, ReLU(0+0)=0).
    bf = jnp.bfloat16
    xp = jnp.pad(x, ((0, b_pad - B), (0, in_pad - in_dim)))
    w1p = jnp.pad(w1.astype(bf), ((0, in_pad - in_dim), (0, h1_pad - h1_dim)))
    w2p = jnp.pad(w2.astype(bf), ((0, h1_pad - h1_dim), (0, h2_pad - h2_dim)))
    w3p = jnp.pad(w3.astype(bf), ((0, h2_pad - h2_dim), (0, out_pad - out_dim)))
    b1p = jnp.pad(b1, ((0, 0), (0, h1_pad - h1_dim)))
    b2p = jnp.pad(b2, ((0, 0), (0, h2_pad - h2_dim)))
    b3p = jnp.pad(b3, ((0, 0), (0, out_pad - out_dim)))

    # Weights/biases: constant block index -> fetched once, VMEM-resident.
    resident = lambda arr: pl.BlockSpec(arr.shape, lambda i: (0, 0))

    out = pl.pallas_call(
        deep_fnn_kernel,
        out_shape=jax.ShapeDtypeStruct((b_pad, out_pad), jnp.float32),
        grid=grid,
        in_specs=[
            pl.BlockSpec((tile_b, in_pad), lambda i: (i, 0)),
            resident(w1p), resident(b1p),
            resident(w2p), resident(b2p),
            resident(w3p), resident(b3p),
        ],
        out_specs=pl.BlockSpec((tile_b, out_pad), lambda i: (i, 0)),
        compiler_params=pltpu.CompilerParams(
            dimension_semantics=("parallel",),  # shard batch across v7x's 2 TCs
        ),
    )(xp, w1p, b1p, w2p, b2p, w3p, b3p)

    return out[:B, :out_dim]


def init_params(key, input_dim, output_dim):
    # PyTorch-style init: U(-1/sqrt(fan_in), 1/sqrt(fan_in)); weights stored
    # [in_features, out_features] (transposed vs nn.Linear) so kernel does x @ W + b.
    dims = [(input_dim, 200), (200, 64), (64, output_dim)]
    params = []
    for fan_in, fan_out in dims:
        kw, kb, key = jax.random.split(key, 3)
        bound = 1.0 / jnp.sqrt(jnp.float32(fan_in))
        w = jax.random.uniform(kw, (fan_in, fan_out), jnp.float32, -bound, bound)
        b = jax.random.uniform(kb, (1, fan_out), jnp.float32, -bound, bound)
        params += [w, b]
    return params


def reference_f32(x, w1, b1, w2, b2, w3, b3):
    h = jnp.maximum(x @ w1 + b1, 0.0)
    h = jnp.maximum(h @ w2 + b2, 0.0)
    return h @ w3 + b3


def reference_matched(x, w1, b1, w2, b2, w3, b3):
    # Same precision recipe as the kernel (bf16 MXU operands, f32 accumulation).
    bf = jnp.bfloat16
    h = jnp.dot(x.astype(bf), w1.astype(bf), preferred_element_type=jnp.float32)
    h = jnp.maximum(h + b1, 0.0)
    h = jnp.dot(h.astype(bf), w2.astype(bf), preferred_element_type=jnp.float32)
    h = jnp.maximum(h + b2, 0.0)
    h = jnp.dot(h.astype(bf), w3.astype(bf), preferred_element_type=jnp.float32)
    return h + b3


if __name__ == "__main__":
    key = jax.random.PRNGKey(0)
    kx, kp = jax.random.split(key)

    input_dim, output_dim = 32, 4
    w1, b1, w2, b2, w3, b3 = init_params(kp, input_dim, output_dim)

    # Small batch (single tile) and a multi-tile batch to exercise the grid path.
    for batch in (8, 300):
        kx, sub = jax.random.split(kx)
        x = jax.random.normal(sub, (batch, input_dim), jnp.float32)

        out = jax.block_until_ready(deep_fnn(x, w1, b1, w2, b2, w3, b3))
        assert out.shape == (batch, output_dim)

        ref = reference_matched(x, w1, b1, w2, b2, w3, b3)
        assert jnp.allclose(out, ref, atol=1e-3, rtol=1e-3), (
            "mismatch vs matched-precision ref: "
            f"{float(jnp.max(jnp.abs(out - ref)))}"
        )
        # Loose sanity check against the full-f32 PyTorch-equivalent forward
        # (bf16 matmul operands cost a few e-3 of absolute error here).
        ref32 = reference_f32(x, w1, b1, w2, b2, w3, b3)
        assert jnp.allclose(out, ref32, atol=2e-1, rtol=2e-1)

    print("KERNEL_OK")
</pallas_src>

<mosaic_0001>
module attributes {stable_mosaic.version = 11 : i64} {
  func.func @deep_fnn_kernel(%arg0: i32, %arg1: memref<8x128xf32, #tpu.memory_space<vmem>>, %arg2: memref<128x256xbf16, #tpu.memory_space<vmem>>, %arg3: memref<1x256xf32, #tpu.memory_space<vmem>>, %arg4: memref<256x128xbf16, #tpu.memory_space<vmem>>, %arg5: memref<1x128xf32, #tpu.memory_space<vmem>>, %arg6: memref<128x128xbf16, #tpu.memory_space<vmem>>, %arg7: memref<1x128xf32, #tpu.memory_space<vmem>>, %arg8: memref<8x128xf32, #tpu.memory_space<vmem>>) attributes {dimension_semantics = [#tpu.dimension_semantics<parallel>], iteration_bounds = array<i64: 1>, scalar_prefetch = 0 : i64, scratch_operands = 0 : i64, tpu.core_type = #tpu.core_type<tc>, window_params = [{transform_indices = @transform_0, window_bounds = array<i64: 8, 128>}, {pipeline_mode = #tpu.pipeline_mode<synchronous>, transform_indices = @transform_1, window_bounds = array<i64: 128, 256>}, {pipeline_mode = #tpu.pipeline_mode<synchronous>, transform_indices = @transform_2, window_bounds = array<i64: 1, 256>}, {pipeline_mode = #tpu.pipeline_mode<synchronous>, transform_indices = @transform_3, window_bounds = array<i64: 256, 128>}, {pipeline_mode = #tpu.pipeline_mode<synchronous>, transform_indices = @transform_4, window_bounds = array<i64: 1, 128>}, {pipeline_mode = #tpu.pipeline_mode<synchronous>, transform_indices = @transform_5, window_bounds = array<i64: 128, 128>}, {pipeline_mode = #tpu.pipeline_mode<synchronous>, transform_indices = @transform_6, window_bounds = array<i64: 1, 128>}, {transform_indices = @transform_7, window_bounds = array<i64: 8, 128>}]} {
    %c0 = arith.constant 0 : index
    %c0_0 = arith.constant 0 : index
    %0 = vector.load %arg1[%c0, %c0_0] : memref<8x128xf32, #tpu.memory_space<vmem>>, vector<8x128xf32>
    %1 = arith.truncf %0 : vector<8x128xf32> to vector<8x128xbf16>
    %c0_1 = arith.constant 0 : index
    %c0_2 = arith.constant 0 : index
    %2 = vector.load %arg2[%c0_1, %c0_2] : memref<128x256xbf16, #tpu.memory_space<vmem>>, vector<128x256xbf16>
    %cst = arith.constant dense<0.000000e+00> : vector<8x256xf32>
    %3 = tpu.matmul %1, %2, %cst {dimension_numbers = #tpu.dot_dimension_numbers<[1], [0], [0], [1], [0, 0, 1, 1], [], []>} : vector<8x128xbf16>, vector<128x256xbf16>, vector<8x256xf32> -> vector<8x256xf32>
    %c0_3 = arith.constant 0 : index
    %c0_4 = arith.constant 0 : index
    %4 = vector.load %arg3[%c0_3, %c0_4] : memref<1x256xf32, #tpu.memory_space<vmem>>, vector<1x256xf32>
    %5 = vector.broadcast %4 : vector<1x256xf32> to vector<8x256xf32>
    %6 = arith.addf %3, %5 : vector<8x256xf32>
    %cst_5 = arith.constant 0.000000e+00 : f32
    %7 = vector.broadcast %cst_5 : f32 to vector<8x256xf32>
    %8 = arith.maximumf %6, %7 : vector<8x256xf32>
    %9 = arith.truncf %8 : vector<8x256xf32> to vector<8x256xbf16>
    %c0_6 = arith.constant 0 : index
    %c0_7 = arith.constant 0 : index
    %10 = vector.load %arg4[%c0_6, %c0_7] : memref<256x128xbf16, #tpu.memory_space<vmem>>, vector<256x128xbf16>
    %cst_8 = arith.constant dense<0.000000e+00> : vector<8x128xf32>
    %11 = tpu.matmul %9, %10, %cst_8 {dimension_numbers = #tpu.dot_dimension_numbers<[1], [0], [0], [1], [0, 0, 1, 1], [], []>} : vector<8x256xbf16>, vector<256x128xbf16>, vector<8x128xf32> -> vector<8x128xf32>
    %c0_9 = arith.constant 0 : index
    %c0_10 = arith.constant 0 : index
    %12 = vector.load %arg5[%c0_9, %c0_10] : memref<1x128xf32, #tpu.memory_space<vmem>>, vector<1x128xf32>
    %13 = vector.broadcast %12 : vector<1x128xf32> to vector<8x128xf32>
    %14 = arith.addf %11, %13 : vector<8x128xf32>
    %cst_11 = arith.constant 0.000000e+00 : f32
    %15 = vector.broadcast %cst_11 : f32 to vector<8x128xf32>
    %16 = arith.maximumf %14, %15 : vector<8x128xf32>
    %17 = arith.truncf %16 : vector<8x128xf32> to vector<8x128xbf16>
    %c0_12 = arith.constant 0 : index
    %c0_13 = arith.constant 0 : index
    %18 = vector.load %arg6[%c0_12, %c0_13] : memref<128x128xbf16, #tpu.memory_space<vmem>>, vector<128x128xbf16>
    %cst_14 = arith.constant dense<0.000000e+00> : vector<8x128xf32>
    %19 = tpu.matmul %17, %18, %cst_14 {dimension_numbers = #tpu.dot_dimension_numbers<[1], [0], [0], [1], [0, 0, 1, 1], [], []>} : vector<8x128xbf16>, vector<128x128xbf16>, vector<8x128xf32> -> vector<8x128xf32>
    %c0_15 = arith.constant 0 : index
    %c0_16 = arith.constant 0 : index
    %20 = vector.load %arg7[%c0_15, %c0_16] : memref<1x128xf32, #tpu.memory_space<vmem>>, vector<1x128xf32>
    %21 = vector.broadcast %20 : vector<1x128xf32> to vector<8x128xf32>
    %22 = arith.addf %19, %21 : vector<8x128xf32>
    %c0_17 = arith.constant 0 : index
    %c0_18 = arith.constant 0 : index
    %23 = vector.load %arg8[%c0_17, %c0_18] : memref<8x128xf32, #tpu.memory_space<vmem>>, vector<8x128xf32>
    tpu.vector_store %arg8[%c0_17, %c0_18], %22 {strides = array<i32>} : memref<8x128xf32, #tpu.memory_space<vmem>>, vector<8x128xf32>,
    return
  }
  func.func @transform_0(%arg0: i32) -> (i32, i32) {
    %c0_i32 = arith.constant 0 : i32
    %c0_i32_0 = arith.constant 0 : i32
    return %arg0, %c0_i32 : i32, i32
  }
  func.func @transform_1(%arg0: i32) -> (i32, i32) {
    %c0_i32 = arith.constant 0 : i32
    %c0_i32_0 = arith.constant 0 : i32
    %c0_i32_1 = arith.constant 0 : i32
    return %c0_i32, %c0_i32_0 : i32, i32
  }
  func.func @transform_2(%arg0: i32) -> (i32, i32) {
    %c0_i32 = arith.constant 0 : i32
    %c0_i32_0 = arith.constant 0 : i32
    %c0_i32_1 = arith.constant 0 : i32
    return %c0_i32, %c0_i32_0 : i32, i32
  }
  func.func @transform_3(%arg0: i32) -> (i32, i32) {
    %c0_i32 = arith.constant 0 : i32
    %c0_i32_0 = arith.constant 0 : i32
    %c0_i32_1 = arith.constant 0 : i32
    return %c0_i32, %c0_i32_0 : i32, i32
  }
  func.func @transform_4(%arg0: i32) -> (i32, i32) {
    %c0_i32 = arith.constant 0 : i32
    %c0_i32_0 = arith.constant 0 : i32
    %c0_i32_1 = arith.constant 0 : i32
    return %c0_i32, %c0_i32_0 : i32, i32
  }
  func.func @transform_5(%arg0: i32) -> (i32, i32) {
    %c0_i32 = arith.constant 0 : i32
    %c0_i32_0 = arith.constant 0 : i32
    %c0_i32_1 = arith.constant 0 : i32
    return %c0_i32, %c0_i32_0 : i32, i32
  }
  func.func @transform_6(%arg0: i32) -> (i32, i32) {
    %c0_i32 = arith.constant 0 : i32
    %c0_i32_0 = arith.constant 0 : i32
    %c0_i32_1 = arith.constant 0 : i32
    return %c0_i32, %c0_i32_0 : i32, i32
  }
  func.func @transform_7(%arg0: i32) -> (i32, i32) {
    %c0_i32 = arith.constant 0 : i32
    %c0_i32_0 = arith.constant 0 : i32
    return %arg0, %c0_i32 : i32, i32
  }
}

</mosaic_0001>

<bundles_post_ra>
// kernel: tpu_custom_call.1
= control target key start
LH: loop header
LB: loop body
LE: loop exit
PB: predicated region body
PF: predicated region fallthrough
CT: control target
= control target key end

     0   :  { %12 = vsyncpa [#allocation3], 0  ;;  %s934_s0 = inlined_call_operand.hbm [shape: f32[8,128], index: 0, kind: input, shape index: {}]   ;;  %s935_s1 = inlined_call_operand.hbm [shape: bf16[128,256], index: 1, kind: input, shape index: {}]   ;;  %s936_s2 = inlined_call_operand.hbm [shape: f32[1,256], index: 2, kind: input, shape index: {}]   ;;  %s937_s3 = inlined_call_operand.hbm [shape: bf16[256,128], index: 3, kind: input, shape index: {}]   ;;  %s938_s4 = inlined_call_operand.vmem [shape: f32[1,128], index: 4, kind: input, shape index: {}]   ;;  %s939_s5 = inlined_call_operand.hbm [shape: bf16[128,128], index: 5, kind: input, shape index: {}]   ;;  %s940_s6 = inlined_call_operand.vmem [shape: f32[1,128], index: 6, kind: input, shape index: {}]   ;;  %s941_s7 = inlined_call_operand.hbm [shape: f32[8,128], index: 7, kind: output, shape index: {}]  }
   0x1   :  { %13 = vsyncpa [#allocation6], 0 }
   0x2   :  { %14 = vsyncpa [#allocation9], 0  ;;  %s31_s26 = sshll.u32 %s935_s1, 4  ;;  %s32_s26 = int_to_ptr.hbm [resolvable:$true] %s31_s26 }
   0x3   :  { %15 = vsyncpa [#allocation4], 0  ;;  %s860_s27 = smov [#allocation5]   ;;  %s55_s8 = sshll.u32 %s937_s3, 4  ;;  %s56_s8 = int_to_ptr.hbm [resolvable:$true] %s55_s8 }
   0x4   :  { %s33_s28 = sshll.u32 %s860_s27, 4  ;;  %s861_s9 = smov 128   ;;  %s34_s28 = int_to_ptr.vmem [resolvable:$true] %s33_s28 }
   0x5   :  { %s862_s10 = smov 8   ;;  %s863_s11 = smov [#allocation8]  }
   0x6   :  { %39 = dma.hbm_to_vmem [thread:$0]  %s32_s26, 2048, %s34_s28, [#allocation6], %s861_s9, %s861_s9, %s862_s10  }
   0x7   :  { %s57_s12 = sshll.u32 %s863_s11, 4  ;;  %s864_s13 = smov 64   ;;  %s58_s12 = int_to_ptr.vmem [resolvable:$true] %s57_s12 }
   0x8   :  { %s865_s14 = smov 4   ;;  %s21_s16 = sshll.u32 %s934_s0, 4  ;;  %s22_s16 = int_to_ptr.hbm [resolvable:$true] %s21_s16 }
   0x9   :  { %63 = dma.hbm_to_vmem [thread:$0]  %s56_s8, 2048, %s58_s12, [#allocation9], %s864_s13, %s864_s13, %s865_s14  }
   0xa   :  { %s866_s17 = smov [#allocation2]   ;;  %s45_s20 = sshll.u32 %s936_s2, 4  ;;  %s46_s20 = int_to_ptr.hbm [resolvable:$true] %s45_s20 }
   0xb   :  { %s23_s18 = sshll.u32 %s866_s17, 4  ;;  %s867_s21 = smov [#allocation7]   ;;  %s24_s18 = int_to_ptr.vmem [resolvable:$true] %s23_s18 }
   0xc   :  { %26 = dma.hbm_to_vmem [thread:$0]  %s22_s16, 128, %s24_s18, [#allocation3]  }
   0xd   :  { %s47_s22 = sshll.u32 %s867_s21, 4  ;;  %s70_s25 = sshll.u32 %s939_s5, 4  ;;  %s48_s22 = int_to_ptr.vmem [resolvable:$true] %s47_s22  ;;  %s71_s25 = int_to_ptr.hbm [resolvable:$true] %s70_s25 }
   0xe   :  { %50 = dma.hbm_to_vmem [thread:$0]  %s46_s20, 32, %s48_s22, [#allocation6]  }
   0xf   :  { %s868_s0 = smov [#allocation10]  }
  0x10   :  { %s72_s26 = sshll.u32 %s868_s0, 4  ;;  %s73_s26 = int_to_ptr.vmem [resolvable:$true] %s72_s26 }
  0x11   :  { %78 = dma.hbm_to_vmem [thread:$0]  %s71_s25, 1024, %s73_s26, [#allocation9], %s864_s13, %s864_s13, %s865_s14  }
  0x12   :  { %852 = dma.done.wait [#allocation3], 128  }
  0x13   :  { %853 = vsyncadd [#allocation3], 4294967168 }
  0x14   :  { %854 = dma.done.wait [#allocation6], 2080  }
  0x15   :  { %855 = vsyncadd [#allocation6], 4294965216 }
  0x16   :  { %856 = dma.done.wait [#allocation9], 3072  }
  0x17   :  { %857 = vsyncadd [#allocation9], 4294964224  ;;  %v554_v0 = vld [vmem:[#allocation5 + $0x70] sm:$0xf]  ;;  %v671_v1 = vld [vmem:[#allocation5 + $0x74] sm:$0xf0] }
  0x18   :  { %v670_v2 = vld [vmem:[#allocation5 + $0x74] sm:$0xf]  ;;  %v555_v3 = vor.u32 %v671_v1, %v554_v0  ;;  %v556_v4 = vld [vmem:[#allocation5 + $0x78] sm:$0xf0]  ;;  %v546_v5 = vld [vmem:[#allocation5 + $0x60] sm:$0xf] }
  0x19   :  { %v669_v6 = vld [vmem:[#allocation5 + $0x64] sm:$0xf0]  ;;  %v559_v7 = vor.u32 %v670_v2, %v556_v4  ;;  %v668_v8 = vld [vmem:[#allocation5 + $0x64] sm:$0xf]  ;;  %v548_v9 = vld [vmem:[#allocation5 + $0x68] sm:$0xf0] }
  0x1a   :  { %205 = vmatpush.bf16.msra.mxu0 %v555_v3  ;;  %v547_v10 = vor.u32 %v669_v6, %v546_v5  ;;  %v551_v11 = vor.u32 %v668_v8, %v548_v9  ;;  %v538_v12 = vld [vmem:[#allocation5 + $0x50] sm:$0xf]  ;;  %v667_v13 = vld [vmem:[#allocation5 + $0x54] sm:$0xf0]  ;;  %v666_v14 = vld [vmem:[#allocation5 + $0x54] sm:$0xf] }
  0x1b   :  { %218 = vmatpush.bf16.msra.mxu1 %v559_v7  ;;  %v540_v15 = vld [vmem:[#allocation5 + $0x58] sm:$0xf0]  ;;  %v539_v16 = vor.u32 %v667_v13, %v538_v12  ;;  %v530_v18 = vld [vmem:[#allocation5 + $0x40] sm:$0xf]  ;;  %v665_v19 = vld [vmem:[#allocation5 + $0x44] sm:$0xf0] }
  0x1c   :  { %v543_v17 = vor.u32 %v666_v14, %v540_v15  ;;  %v664_v20 = vld [vmem:[#allocation5 + $0x44] sm:$0xf]  ;;  %v532_v21 = vld [vmem:[#allocation5 + $0x48] sm:$0xf0]  ;;  %v531_v22 = vor.u32 %v665_v19, %v530_v18  ;;  %v679_v23 = vld [vmem:[#allocation8 + $0x38] sm:$0xff]  ;;  %s869_s29 = smov [#allocation11]  }
  0x1d   :  { %v687_v24 = vld [vmem:[#allocation8 + $0x78] sm:$0xff]  ;;  %v535_v25 = vor.u32 %v664_v20, %v532_v21  ;;  %v522_v26 = vld [vmem:[#allocation5 + $0x30] sm:$0xf]  ;;  %v662_v28 = vld [vmem:[#allocation5 + $0x34] sm:$0xf]  ;;  %367 = vmatpush.bf16.msra.mxu2 %v679_v23  ;;  %s482_s30 = sshll.u32 %s869_s29, 4  ;;  %s483_s30 = int_to_ptr.vmem [resolvable:$true] %s482_s30 }
  0x1e   :  { %206 = vmatpush.bf16.msra.mxu0 %v547_v10  ;;  %v663_v27 = vld [vmem:[#allocation5 + $0x34] sm:$0xf0]  ;;  %v524_v29 = vld [vmem:[#allocation5 + $0x38] sm:$0xf0]  ;;  %380 = vmatpush.bf16.msra.mxu3 %v687_v24  ;;  %v514_v34 = vld [vmem:[#allocation5 + $0x20] sm:$0xf] }
  0x1f   :  { %219 = vmatpush.bf16.msra.mxu1 %v551_v11  ;;  %v678_v30 = vld [vmem:[#allocation8 + $0x30] sm:$0xff]  ;;  %v523_v32 = vor.u32 %v663_v27, %v522_v26  ;;  %v527_v33 = vor.u32 %v662_v28, %v524_v29  ;;  %v661_v35 = vld [vmem:[#allocation5 + $0x24] sm:$0xf0]  ;;  %v660_v36 = vld [vmem:[#allocation5 + $0x24] sm:$0xf]  ;;  %s484_s10 = sshll.u32 %s941_s7, 4  ;;  %s485_s10 = int_to_ptr.hbm [resolvable:$true] %s484_s10 }
  0x20   :  { %v686_v31 = vld [vmem:[#allocation8 + $0x70] sm:$0xff]  ;;  %v516_v37 = vld [vmem:[#allocation5 + $0x28] sm:$0xf0]  ;;  %v515_v40 = vor.u32 %v661_v35, %v514_v34  ;;  %v508_v45 = vld [vmem:[#allocation5 + $0x18] sm:$0xf0] }
  0x21   :  { %368 = vmatpush.bf16.msra.mxu2 %v678_v30  ;;  %v677_v38 = vld [vmem:[#allocation8 + $0x28] sm:$0xff]  ;;  %v519_v41 = vor.u32 %v660_v36, %v516_v37  ;;  %v659_v43 = vld [vmem:[#allocation5 + $0x14] sm:$0xf0]  ;;  %v658_v44 = vld [vmem:[#allocation5 + $0x14] sm:$0xf] }
  0x22   :  { %207 = vmatpush.bf16.msra.mxu0 %v539_v16  ;;  %381 = vmatpush.bf16.msra.mxu3 %v686_v31  ;;  %v685_v39 = vld [vmem:[#allocation8 + $0x68] sm:$0xff]  ;;  %v676_v46 = vld [vmem:[#allocation8 + $0x20] sm:$0xff]  ;;  %v511_v49 = vor.u32 %v658_v44, %v508_v45  ;;  %v675_v54 = vld [vmem:[#allocation8 + $0x18] sm:$0xff] }
  0x23   :  { %220 = vmatpush.bf16.msra.mxu1 %v543_v17  ;;  %v506_v42 = vld [vmem:[#allocation5 + $0x10] sm:$0xf]  ;;  %v684_v47 = vld [vmem:[#allocation8 + $0x60] sm:$0xff]  ;;  %v500_v53 = vld [vmem:[#allocation5 + $0x8] sm:$0xf0] }
  0x24   :  { %v507_v48 = vor.u32 %v659_v43, %v506_v42  ;;  %v498_v50 = vld [vmem:[#allocation5] sm:$0xf]  ;;  %v657_v51 = vld [vmem:[#allocation5 + $0x4] sm:$0xf0]  ;;  %v656_v52 = vld [vmem:[#allocation5 + $0x4] sm:$0xf] }
  0x25   :  { %369 = vmatpush.bf16.msra.mxu2 %v677_v38  ;;  %v683_v55 = vld [vmem:[#allocation8 + $0x58] sm:$0xff]  ;;  %v499_v56 = vor.u32 %v657_v51, %v498_v50  ;;  %v503_v58 = vor.u32 %v656_v52, %v500_v53  ;;  %v674_v59 = vld [vmem:[#allocation8 + $0x10] sm:$0xff]  ;;  %v673_v62 = vld [vmem:[#allocation8 + $0x8] sm:$0xff] }
  0x26   :  { %208 = vmatpush.bf16.msra.mxu0 %v531_v22  ;;  %382 = vmatpush.bf16.msra.mxu3 %v685_v39  ;;  %v101_v57 = vld [vmem:[#allocation2] sm:$0xff]  ;;  %v681_v63 = vld [vmem:[#allocation8 + $0x48] sm:$0xff]  ;;  %v672_v0 = vld [vmem:[#allocation8] sm:$0xff] }
  0x27   :  { %221 = vmatpush.bf16.msra.mxu1 %v535_v25  ;;  %v682_v60 = vld [vmem:[#allocation8 + $0x50] sm:$0xff]  ;;  %v102_v61 = vpack.c.bf16 %v101_v57, %v101_v57  ;;  %v680_v1 = vld [vmem:[#allocation8 + $0x40] sm:$0xff]  ;;  %v695_v2 = vld [vmem:[#allocation10 + $0x38] sm:$0xff] }
  0x28   :  { %v694_v3 = vld [vmem:[#allocation10 + $0x30] sm:$0xff]  ;;  %v693_v4 = vld [vmem:[#allocation10 + $0x28] sm:$0xff]  ;;  %v692_v5 = vld [vmem:[#allocation10 + $0x20] sm:$0xff] }
  0x29   :  { %370 = vmatpush.bf16.msra.mxu2 %v676_v46  ;;  %v691_v6 = vld [vmem:[#allocation10 + $0x18] sm:$0xff]  ;;  %v690_v8 = vld [vmem:[#allocation10 + $0x10] sm:$0xff]  ;;  %v689_v21 = vld [vmem:[#allocation10 + $0x8] sm:$0xff] }
  0x2a   :  { %209 = vmatpush.bf16.msra.mxu0 %v523_v32  ;;  %383 = vmatpush.bf16.msra.mxu3 %v684_v47  ;;  %v119_v7 = vld [vmem:[#allocation7] sm:$0x3]  ;;  %v688_v22 = vld [vmem:[#allocation10] sm:$0xff]  ;;  %v706_v23 = vld [vmem:[%s938_s4] ss:$0 sm:$0xff] }
  0x2b   :  { %222 = vmatpush.bf16.msra.mxu1 %v527_v33  ;;  %v121_v9 = vperm.slane %v119_v7, 0  ;;  %v122_v10 = vperm.slane %v119_v7, 1  ;;  %v707_v32 = vld [vmem:[%s940_s6] ss:$0 sm:$0xff] }
  0x2d   :  { %371 = vmatpush.bf16.msra.mxu2 %v675_v54 }
  0x2e   :  { %210 = vmatpush.bf16.msra.mxu0 %v515_v40  ;;  %384 = vmatpush.bf16.msra.mxu3 %v683_v55 }
  0x2f   :  { %223 = vmatpush.bf16.msra.mxu1 %v519_v41 }
  0x31   :  { %372 = vmatpush.bf16.msra.mxu2 %v674_v59 }
  0x32   :  { %211 = vmatpush.bf16.msra.mxu0 %v507_v48  ;;  %385 = vmatpush.bf16.msra.mxu3 %v682_v60 }
  0x33   :  { %224 = vmatpush.bf16.msra.mxu1 %v511_v49 }
  0x35   :  { %373 = vmatpush.bf16.msra.mxu2 %v673_v62 }
  0x36   :  { %212 = vmatpush.bf16.msra.mxu0 %v499_v56  ;;  %386 = vmatpush.bf16.msra.mxu3 %v681_v63 }
  0x37   :  { %225 = vmatpush.bf16.msra.mxu1 %v503_v58 }
  0x39   :  { %213 = vmatmul.bf16.vlgmr.msra.gmra.mxu0 %v102_v61  ;;  %374 = vmatpush.bf16.msra.mxu2 %v672_v0 }
  0x3a   :  { %226 = vmatmul.bf16.vlgmr.msra.gmra.mxu1 %v102_v61  ;;  %387 = vmatpush.bf16.msra.mxu3 %v680_v1 }
  0x3b   :  { %463 = vmatpush.bf16.msrb.mxu0 %v695_v2 }
  0x3f   :  { %464 = vmatpush.bf16.msrb.mxu0 %v694_v3 }
  0x43   :  { %465 = vmatpush.bf16.msrb.mxu0 %v693_v4 }
  0x47   :  { %466 = vmatpush.bf16.msrb.mxu0 %v692_v5 }
  0x4b   :  { %467 = vmatpush.bf16.msrb.mxu0 %v691_v6 }
  0x4f   :  { %468 = vmatpush.bf16.msrb.mxu0 %v690_v8 }
  0x53   :  { %469 = vmatpush.bf16.msrb.mxu0 %v689_v21 }
  0x57   :  { %470 = vmatpush.bf16.msrb.mxu0 %v688_v22 }
  0xb6   :  { %v214_v11 = vpop.f32.mrf.mxu0 }
  0xb7   :  { %v215_v12 = vadd.f32 %v214_v11, %v121_v9  ;;  %v227_v13 = vpop.f32.mrf.mxu1 }
  0xb8   :  { %v228_v14 = vadd.f32 %v227_v13, %v122_v10 }
  0xb9   :  { %v231_v15 = vmax.f32 %v215_v12, 0.0 }
  0xba   :  { %v232_v16 = vmax.f32 %v228_v14, 0.0 }
  0xbb   :  { %v233_v17 = vpack.c.bf16 %v231_v15, %v231_v15 }
  0xbc   :  { %v234_v18 = vpack.c.bf16 %v232_v16, %v232_v16 }
  0xbd   :  { %375 = vmatmul.bf16.vlgmr.msra.gmra.mxu2 %v233_v17 }
  0xbe   :  { %388 = vmatmul.bf16.vlgmr.msra.gmra.mxu3 %v234_v18  ;;  %v216_v19 = vpop.f32.mrf.mxu0 }
  0xbf   :  { %v229_v20 = vpop.f32.mrf.mxu1 }
 0x140   :  { %v376_v24 = vpop.f32.mrf.mxu2 }
 0x141   :  { %v377_v25 = vadd.f32 %v706_v23, %v376_v24  ;;  %v389_v26 = vpop.f32.mrf.mxu3 }
 0x143   :  { %v390_v27 = vadd.f32 %v389_v26, %v377_v25 }
 0x145   :  { %v393_v28 = vmax.f32 %v390_v27, 0.0 }
 0x147   :  { %v394_v29 = vpack.c.bf16 %v393_v28, %v393_v28 }
 0x148   :  { %v378_v30 = vpop.f32.mrf.mxu2 }
 0x149   :  { %v391_v31 = vpop.f32.mrf.mxu3  ;;  %471 = vmatmul.bf16.vlgmr.msrb.gmra.mxu0 %v394_v29 }
 0x1c6   :  { %v472_v33 = vpop.f32.mrf.mxu0 }
 0x1c7   :  { %v473_v34 = vadd.f32 %v707_v32, %v472_v33 }
 0x1c9   :  { %476 = vst [vmem:[#allocation11] sm:$0xff] %v473_v34 }
 0x1ca   :  { %487 = dma.vmem_to_hbm [thread:$0]  %s483_s30, 128, %s485_s10, [#allocation4]  }
 0x1ce   :  { %v474_v35 = vpop.f32.mrf.mxu0 }
 0x1cf   :  { %858 = dma.done.wait [#allocation4], 128  }
 0x1d0   :  { %859 = vsyncadd [#allocation4], 4294967168 }
 0x1d1   :  { %492 = vsyncpa [#allocation3], 1 }
 0x1d2   :  { %493 = vsyncpa [#allocation6], 1 }
 0x1d3   :  { %494 = vsyncpa [#allocation9], 1 }
 0x1d4   :  { %495 = vsyncpa [#allocation4], 1 }

</bundles_post_ra>
